<compile_context>
chip_gen: v7x
topology: tpu7x:2x2x1
jax: 0.10.0
libtpu: 0.0.40
codegen_flags: <defaults>
</compile_context>

<pallas_src>
import functools

import jax
import jax.numpy as jnp
from jax.experimental import pallas as pl
from jax.experimental.pallas import tpu as pltpu

# Conservative budgets so the same tile plan works on v7x (64 MiB physical VMEM)
# as well as v5e/v6e (128 MiB).
_VMEM_BUDGET_BYTES = 40 * 1024 * 1024   # used to choose TILE_B
_VMEM_LIMIT_BYTES = 56 * 1024 * 1024    # scoped limit handed to Mosaic


def _round_up(n, m):
    return ((n + m - 1) // m) * m


def two_layer_relu_kernel(x_ref, w1_ref, b1_ref, w2_ref, b2_ref, o_ref):
    # f(x) = b2 + relu(x @ W1 + b1) @ W2 for one (TILE_B, :) tile of x.
    # bf16 MXU operands, f32 accumulation; bias-add / ReLU stay f32 on the VPU.
    x = x_ref[...].astype(jnp.bfloat16)
    h = jnp.dot(x, w1_ref[...], preferred_element_type=jnp.float32)
    h = jnp.maximum(h + b1_ref[...], 0.0)                       # ReLU in f32
    z = jnp.dot(h.astype(jnp.bfloat16), w2_ref[...],
                preferred_element_type=jnp.float32)
    o_ref[...] = (z + b2_ref[...]).astype(o_ref.dtype)


def prepare_params(w1, b1, w2, b2, compute_dtype=jnp.bfloat16):
    """One-time PyTorch->TPU layout prep (call once at parameter-load time).

    w1: (hid, in_f), b1: (hid,), w2: (out_f, hid), b2: (out_f,)  [PyTorch layout]
    Returns transposed weights padded to 128-lane multiples (zero padding is
    exact: padded hidden units give relu(0)=0 and padded outputs are sliced off).
    """
    hid, in_f = w1.shape
    out_f = w2.shape[0]
    hid_p = _round_up(hid, 128)
    out_p = _round_up(out_f, 128)

    w1_t = jnp.zeros((in_f, hid_p), compute_dtype).at[:, :hid].set(
        jnp.asarray(w1, jnp.float32).T.astype(compute_dtype))
    b1_p = jnp.zeros((1, hid_p), jnp.float32).at[:, :hid].set(
        jnp.asarray(b1, jnp.float32)[None, :])
    w2_t = jnp.zeros((hid_p, out_p), compute_dtype).at[:hid, :out_f].set(
        jnp.asarray(w2, jnp.float32).T.astype(compute_dtype))
    b2_p = jnp.zeros((1, out_p), jnp.float32).at[:, :out_f].set(
        jnp.asarray(b2, jnp.float32)[None, :])
    return dict(w1=w1_t, b1=b1_p, w2=w2_t, b2=b2_p, out_f=out_f)


def _choose_tile_b(batch, in_f, hid_p, out_p, x_itemsize, budget_bytes):
    """Largest batch tile (multiple of 8, capped at 512) fitting the VMEM budget."""
    # Weights/biases double-buffered conservatively; x/out tiles double-buffered;
    # intermediate h held once in f32 + once in bf16.
    fixed = 2 * (in_f * hid_p * 2 + hid_p * out_p * 2 + (hid_p + out_p) * 4)
    per_row = 2 * in_f * x_itemsize + 2 * out_p * 4 + hid_p * (4 + 2)
    tile = 512
    while tile > 8 and fixed + tile * per_row > budget_bytes:
        tile //= 2
    if tile >= batch:
        return batch            # single full-batch block (full dim is always legal)
    return max(8, tile)


def two_layer_relu_forward(x, params):
    """x: (B, in_f) in its native dtype; params from prepare_params()."""
    w1, b1, w2, b2 = params["w1"], params["b1"], params["w2"], params["b2"]
    out_f = params["out_f"]
    B, in_f = x.shape
    hid_p = w1.shape[1]
    out_p = w2.shape[1]

    tile_b = _choose_tile_b(B, in_f, hid_p, out_p, x.dtype.itemsize,
                            _VMEM_BUDGET_BYTES)
    grid = (pl.cdiv(B, tile_b),)

    flops = 2 * B * (in_f * hid_p + hid_p * out_p)
    bytes_accessed = (x.size * x.dtype.itemsize
                      + w1.size * w1.dtype.itemsize
                      + w2.size * w2.dtype.itemsize
                      + (b1.size + b2.size) * 4
                      + B * out_p * 4)

    out_padded = pl.pallas_call(
        two_layer_relu_kernel,
        out_shape=jax.ShapeDtypeStruct((B, out_p), jnp.float32),
        grid=grid,
        in_specs=[
            pl.BlockSpec((tile_b, in_f), lambda i: (i, 0)),   # x: tiled over batch
            pl.BlockSpec((in_f, hid_p), lambda i: (0, 0)),    # w1: fully resident
            pl.BlockSpec((1, hid_p), lambda i: (0, 0)),       # b1
            pl.BlockSpec((hid_p, out_p), lambda i: (0, 0)),   # w2: fully resident
            pl.BlockSpec((1, out_p), lambda i: (0, 0)),       # b2
        ],
        out_specs=pl.BlockSpec((tile_b, out_p), lambda i: (i, 0)),
        compiler_params=pltpu.CompilerParams(
            dimension_semantics=("parallel",),
            vmem_limit_bytes=_VMEM_LIMIT_BYTES),
        cost_estimate=pl.CostEstimate(flops=flops, transcendentals=0,
                                      bytes_accessed=bytes_accessed),
    )(x, w1, b1, w2, b2)

    # Slice away the lane-padding of the output feature dim (no-op if already 128k).
    return out_padded[:, :out_f] if out_p != out_f else out_padded


def init_params(key, in_f, hid, out_f):
    """Deterministic init mimicking nn.Linear (uniform in ±1/sqrt(fan_in))."""
    k1, k2, k3, k4 = jax.random.split(key, 4)
    bound1 = 1.0 / jnp.sqrt(jnp.float32(in_f))
    bound2 = 1.0 / jnp.sqrt(jnp.float32(hid))
    w1 = jax.random.uniform(k1, (hid, in_f), jnp.float32, -bound1, bound1)
    b1 = jax.random.uniform(k2, (hid,), jnp.float32, -bound1, bound1)
    w2 = jax.random.uniform(k3, (out_f, hid), jnp.float32, -bound2, bound2)
    b2 = jax.random.uniform(k4, (out_f,), jnp.float32, -bound2, bound2)
    return w1, b1, w2, b2


if __name__ == "__main__":
    # ModuleParams defaults: linear_in/hidden/out_features = 2.
    in_f, hid, out_f = 2, 2, 2
    batch = 1024   # large enough to exercise the batch grid (TILE_B=512 -> 2 steps)

    key = jax.random.PRNGKey(0)
    kx, kp = jax.random.split(key)
    x = jax.random.normal(kx, (batch, in_f), jnp.float32)
    w1, b1, w2, b2 = init_params(kp, in_f, hid, out_f)

    # One-time layout / padding / bf16 conversion of the parameters.
    params = prepare_params(w1, b1, w2, b2)

    out = two_layer_relu_forward(x, params)
    out = jax.block_until_ready(out)

    # Pure-JAX f32 reference of the same forward semantics (bf16 MXU operands in
    # the kernel => relax tolerance).
    ref = jnp.maximum(x @ w1.T + b1, 0.0) @ w2.T + b2
    assert out.shape == (batch, out_f)
    assert jnp.allclose(out, ref, atol=5e-2, rtol=5e-2), "mismatch vs reference"

    print("KERNEL_OK")
</pallas_src>

<mosaic_0001>
module attributes {stable_mosaic.version = 11 : i64} {
  func.func @two_layer_relu_kernel(%arg0: i32, %arg1: memref<512x2xf32, #tpu.memory_space<vmem>>, %arg2: memref<2x128xbf16, #tpu.memory_space<vmem>>, %arg3: memref<1x128xf32, #tpu.memory_space<vmem>>, %arg4: memref<128x128xbf16, #tpu.memory_space<vmem>>, %arg5: memref<1x128xf32, #tpu.memory_space<vmem>>, %arg6: memref<512x128xf32, #tpu.memory_space<vmem>>) attributes {dimension_semantics = [#tpu.dimension_semantics<parallel>], iteration_bounds = array<i64: 2>, scalar_prefetch = 0 : i64, scratch_operands = 0 : i64, tpu.core_type = #tpu.core_type<tc>, window_params = [{transform_indices = @transform_0, window_bounds = array<i64: 512, 2>}, {pipeline_mode = #tpu.pipeline_mode<synchronous>, transform_indices = @transform_1, window_bounds = array<i64: 2, 128>}, {pipeline_mode = #tpu.pipeline_mode<synchronous>, transform_indices = @transform_2, window_bounds = array<i64: 1, 128>}, {pipeline_mode = #tpu.pipeline_mode<synchronous>, transform_indices = @transform_3, window_bounds = array<i64: 128, 128>}, {pipeline_mode = #tpu.pipeline_mode<synchronous>, transform_indices = @transform_4, window_bounds = array<i64: 1, 128>}, {transform_indices = @transform_5, window_bounds = array<i64: 512, 128>}]} {
    %c0 = arith.constant 0 : index
    %c0_0 = arith.constant 0 : index
    %0 = vector.load %arg1[%c0, %c0_0] : memref<512x2xf32, #tpu.memory_space<vmem>>, vector<512x2xf32>
    %1 = arith.truncf %0 : vector<512x2xf32> to vector<512x2xbf16>
    %c0_1 = arith.constant 0 : index
    %c0_2 = arith.constant 0 : index
    %2 = vector.load %arg2[%c0_1, %c0_2] : memref<2x128xbf16, #tpu.memory_space<vmem>>, vector<2x128xbf16>
    %cst = arith.constant dense<0.000000e+00> : vector<512x128xf32>
    %3 = tpu.matmul %1, %2, %cst {dimension_numbers = #tpu.dot_dimension_numbers<[1], [0], [0], [1], [0, 0, 1, 1], [], []>} : vector<512x2xbf16>, vector<2x128xbf16>, vector<512x128xf32> -> vector<512x128xf32>
    %c0_3 = arith.constant 0 : index
    %c0_4 = arith.constant 0 : index
    %4 = vector.load %arg3[%c0_3, %c0_4] : memref<1x128xf32, #tpu.memory_space<vmem>>, vector<1x128xf32>
    %5 = vector.broadcast %4 : vector<1x128xf32> to vector<512x128xf32>
    %6 = arith.addf %3, %5 : vector<512x128xf32>
    %cst_5 = arith.constant 0.000000e+00 : f32
    %7 = vector.broadcast %cst_5 : f32 to vector<512x128xf32>
    %8 = arith.maximumf %6, %7 : vector<512x128xf32>
    %9 = arith.truncf %8 : vector<512x128xf32> to vector<512x128xbf16>
    %c0_6 = arith.constant 0 : index
    %c0_7 = arith.constant 0 : index
    %10 = vector.load %arg4[%c0_6, %c0_7] : memref<128x128xbf16, #tpu.memory_space<vmem>>, vector<128x128xbf16>
    %cst_8 = arith.constant dense<0.000000e+00> : vector<512x128xf32>
    %11 = tpu.matmul %9, %10, %cst_8 {dimension_numbers = #tpu.dot_dimension_numbers<[1], [0], [0], [1], [0, 0, 1, 1], [], []>} : vector<512x128xbf16>, vector<128x128xbf16>, vector<512x128xf32> -> vector<512x128xf32>
    %c0_9 = arith.constant 0 : index
    %c0_10 = arith.constant 0 : index
    %12 = vector.load %arg5[%c0_9, %c0_10] : memref<1x128xf32, #tpu.memory_space<vmem>>, vector<1x128xf32>
    %13 = vector.broadcast %12 : vector<1x128xf32> to vector<512x128xf32>
    %14 = arith.addf %11, %13 : vector<512x128xf32>
    %c0_11 = arith.constant 0 : index
    %c0_12 = arith.constant 0 : index
    %15 = vector.load %arg6[%c0_11, %c0_12] : memref<512x128xf32, #tpu.memory_space<vmem>>, vector<512x128xf32>
    tpu.vector_store %arg6[%c0_11, %c0_12], %14 {strides = array<i32>} : memref<512x128xf32, #tpu.memory_space<vmem>>, vector<512x128xf32>,
    return
  }
  func.func @transform_0(%arg0: i32) -> (i32, i32) {
    %c0_i32 = arith.constant 0 : i32
    %c0_i32_0 = arith.constant 0 : i32
    return %arg0, %c0_i32 : i32, i32
  }
  func.func @transform_1(%arg0: i32) -> (i32, i32) {
    %c0_i32 = arith.constant 0 : i32
    %c0_i32_0 = arith.constant 0 : i32
    %c0_i32_1 = arith.constant 0 : i32
    return %c0_i32, %c0_i32_0 : i32, i32
  }
  func.func @transform_2(%arg0: i32) -> (i32, i32) {
    %c0_i32 = arith.constant 0 : i32
    %c0_i32_0 = arith.constant 0 : i32
    %c0_i32_1 = arith.constant 0 : i32
    return %c0_i32, %c0_i32_0 : i32, i32
  }
  func.func @transform_3(%arg0: i32) -> (i32, i32) {
    %c0_i32 = arith.constant 0 : i32
    %c0_i32_0 = arith.constant 0 : i32
    %c0_i32_1 = arith.constant 0 : i32
    return %c0_i32, %c0_i32_0 : i32, i32
  }
  func.func @transform_4(%arg0: i32) -> (i32, i32) {
    %c0_i32 = arith.constant 0 : i32
    %c0_i32_0 = arith.constant 0 : i32
    %c0_i32_1 = arith.constant 0 : i32
    return %c0_i32, %c0_i32_0 : i32, i32
  }
  func.func @transform_5(%arg0: i32) -> (i32, i32) {
    %c0_i32 = arith.constant 0 : i32
    %c0_i32_0 = arith.constant 0 : i32
    return %arg0, %c0_i32 : i32, i32
  }
}

</mosaic_0001>

<bundles_post_ra>
// kernel: tpu_custom_call.1
= control target key start
LH: loop header
LB: loop body
LE: loop exit
PB: predicated region body
PF: predicated region fallthrough
CT: control target
= control target key end

     0   :  { %10 = vsyncpa [#allocation3], 0  ;;  %s2190_s0 = inlined_call_operand.vmem [shape: f32[1024,2], index: 0, kind: input, shape index: {}]   ;;  %s2191_s1 = inlined_call_operand.vmem [shape: bf16[2,128], index: 1, kind: input, shape index: {}]   ;;  %s2192_s2 = inlined_call_operand.vmem [shape: f32[1,128], index: 2, kind: input, shape index: {}]   ;;  %s2193_s3 = inlined_call_operand.vmem [shape: bf16[128,128], index: 3, kind: input, shape index: {}]   ;;  %s2194_s4 = inlined_call_operand.vmem [shape: f32[1,128], index: 4, kind: input, shape index: {}]   ;;  %s2195_s5 = inlined_call_operand.hbm [shape: f32[1024,128], index: 5, kind: output, shape index: {}]  }
   0x1   :  { %12 = vsyncpa [#allocation3 + $0x1], 0  ;;  %s1754_s18 = smov 0   ;;  %s1756_s19 = smov 0  }
   0x2   :  { %s1758_s20 = smov 0   ;;  %s1760_s21 = smov 0  }
   0x3 LB: > { %s1775_s22 = sadd.s32 4294967295, %s1719_s21   ;;  %s1317_s23 = sadd.s32 4294967294, %s1719_s21   ;;  %s1719_s21 = sphi %s1760_s21, %s2201_s21   ;;  %s1715_s20 = sphi %s1758_s20, %s2200_s20   ;;  %s1711_s19 = sphi %s1756_s19, %s2199_s19   ;;  %s1707_s18 = sphi %s1754_s18, %s2198_s18  }
   0x4   : > { %s1779_s24 = sadd.s32 1, %s1719_s21   ;;  %s135_s25 = sadd.s32 1, %s1715_s20 }
   0x5   : > { %s132_s26 = ssub.s32 %s1719_s21, %s1779_s24  ;;  %p145_p0 = scmp.ne.s32.totalorder %s1715_s20, %s1711_s19 }
   0x6   : > { %p133_p1 = scmp.eq.s32.totalorder %s132_s26, 0  ;;  %p146_p2 = scmp.eq.s32.totalorder %s1775_s22, 1 }
   0x7   : > { %p151_p3 = scmp.ne.s32.totalorder %s1711_s19, %s1707_s18  ;;  %p152_p4 = scmp.eq.s32.totalorder %s1317_s23, 1 }
   0x8   : > { %s1790_s27 = scalar_select %p133_p1, %s1715_s20, %s135_s25  }
   0x9   : > { %p1792_p5 = por %p146_p2, %p145_p0  ;;  %p1796_p6 = por %p152_p4, %p151_p3 }
   0xa   : > { %p1320_p7 = scmp.ge.s32.totalorder %s1719_s21, 1  ;;  %p191_p8 = scmp.lt.s32.totalorder %s1719_s21, 3 }
   0xc   : > { %p192_p9 = pnand %p1320_p7, %p191_p8 }
   0xd   : > { %v323_v0 = vld [vmem:[%s2191_s1] sm:$0x1] (!%p192_p9)  ;;  %vm428_vm0 = vcmask (!%p192_p9), 1040384   ;;  %s1322_s7 = sshll.u32 (!%p192_p9), %s1775_s22, 6  ;;  %v1650_v3 = vld [vmem:[%s2193_s3 + $0x8] sm:$0xff] (!%p192_p9)   ;;  %vm331_vm1 = vcmask (!%p192_p9), 15360  }
   0xe   : > { %195 = sbr.rel (%p192_p9) target bundleno = 602 (0x25a), region = 40  ;;  %1607 = vmatprep.subr.msk.bf16.mxu0 (!%p192_p9), %vm428_vm0, %v323_v0  ;;  %v430_v1 = vsel (!%p192_p9), %vm428_vm0, %v323_v0, 0  ;;  %p220_p10 = scmp.lt.s32.totalorder (!%p192_p9), %s1322_s7, 127  ;;  %v1649_v2 = vld [vmem:[%s2193_s3] sm:$0xff] (!%p192_p9)   ;;  %v1651_v13 = vld [vmem:[%s2193_s3 + $0x10] sm:$0xff] (!%p192_p9)   ;;  %v1652_v18 = vld [vmem:[%s2193_s3 + $0x18] sm:$0xff] (!%p192_p9)  }
   0xf   : > { %1446 = vmatpush3.bf16.msra.mxu0 (!%p192_p9), %v430_v1  ;;  %1591 = vmatprep.subr.bf16.mxu1 (!%p192_p9), %v1649_v2  ;;  %v1653_v21 = vld [vmem:[%s2193_s3 + $0x20] sm:$0xff] (!%p192_p9)   ;;  %v1654_v32 = vld [vmem:[%s2193_s3 + $0x28] sm:$0xff] (!%p192_p9)   ;;  %s216_s14 = sand.u32 (!%p192_p9), 1, %s1711_s19   ;;  %s1371_s25 = sshll.u32 (!%p192_p9), %s1775_s22, 13 }
  0x10   : > { %1511 = vmatprep.subr.bf16.mxu0 (!%p192_p9), %v1649_v2  ;;  %1599 = vmatpush3.bf16.msra.mxu1 (!%p192_p9), %v1649_v2  ;;  %s2149_s22 = scalar_lea.sflag (!%p192_p9), [#allocation3], %s216_s14  ;;  %s1721_s9 = smov (!%p192_p9), [#allocation2]  }
  0x11   : > { %1592 = vmatprep.subr.bf16.mxu1 (!%p192_p9), %v1650_v3 }
  0x14   : > { %1600 = vmatpush3.bf16.msra.mxu1 (!%p192_p9), %v1650_v3 }
  0x15   : > { %s2203_s7 = smov (!%p220_p10, %s1322_s7), 127  ;;  %1593 = vmatprep.subr.bf16.mxu1 %v1651_v13 }
  0x16   : > { %s1323_s10 = sshll.u32 %s2203_s7, 3  ;;  %s2139_s7 = scalar_lea.hbm %s2195_s5, %s1371_s25 }
  0x17   : > { %s1815_s15 = scalar_lea.vmem %s2190_s0, %s1323_s10  ;;  %s1661_s10 = sshll.u32 %s1721_s9, 4  ;;  %s1662_s10 = int_to_ptr.vmem [resolvable:$false] %s1661_s10 }
  0x18   : > { %v227_v4 = vld [vmem:[%s1815_s15] sm:$0xff]  ;;  %v228_v5 = vld [vmem:[%s1815_s15 + $0x8] sm:$0xff]  ;;  %v229_v6 = vld [vmem:[%s1815_s15 + $0x10] sm:$0xff]  ;;  %1601 = vmatpush3.bf16.msra.mxu1 %v1651_v13  ;;  %s1663_s11 = scalar_lea.vmem %s1662_s10, 16384 }
  0x19   : > { %v291_v7 = vpack.c.bf16 %v228_v5, %v227_v4  ;;  %v230_v8 = vld [vmem:[%s1815_s15 + $0x18] sm:$0xff]  ;;  %v231_v9 = vld [vmem:[%s1815_s15 + $0x20] sm:$0xff]  ;;  %v232_v10 = vld [vmem:[%s1815_s15 + $0x28] sm:$0xff]  ;;  %1594 = vmatprep.subr.bf16.mxu1 %v1652_v18 }
  0x1a   : > { %v292_v11 = vpack.c.bf16 %v230_v8, %v229_v6  ;;  %v293_v12 = vpack.c.bf16 %v232_v10, %v231_v9  ;;  %v233_v14 = vld [vmem:[%s1815_s15 + $0x30] sm:$0xff]  ;;  %v234_v15 = vld [vmem:[%s1815_s15 + $0x38] sm:$0xff]  ;;  %v235_v16 = vld [vmem:[%s1815_s15 + $0x40] sm:$0xff] }
  0x1b   : > { %1447 = vmatprep.mubr.msk.bf16.mxu0 %vm331_vm1, %v291_v7  ;;  %v236_v17 = vld [vmem:[%s1815_s15 + $0x48] sm:$0xff]  ;;  %v294_v19 = vpack.c.bf16 %v234_v15, %v233_v14  ;;  %v237_v22 = vld [vmem:[%s1815_s15 + $0x50] sm:$0xff]  ;;  %v238_v23 = vld [vmem:[%s1815_s15 + $0x58] sm:$0xff] }
  0x1c   : > { %1448 = vmatmul.mubr.msk.bf16.vlgmr.msra.gmra.mrb[0].mxu0 %vm331_vm1, %v292_v11  ;;  %v295_v20 = vpack.c.bf16 %v236_v17, %v235_v16  ;;  %1602 = vmatpush3.bf16.msra.mxu1 %v1652_v18  ;;  %v239_v24 = vld [vmem:[%s1815_s15 + $0x60] sm:$0xff]  ;;  %v240_v25 = vld [vmem:[%s1815_s15 + $0x68] sm:$0xff]  ;;  %v296_v26 = vpack.c.bf16 %v238_v23, %v237_v22  ;;  %v241_v28 = vld [vmem:[%s1815_s15 + $0x70] sm:$0xff] }
  0x1d   : > { %1451 = vmatprep.mubr.msk.bf16.mxu0 %vm331_vm1, %v293_v12  ;;  %1512 = vmatpush3.bf16.msra.mxu0 %v1649_v2  ;;  %v297_v27 = vpack.c.bf16 %v240_v25, %v239_v24  ;;  %v242_v29 = vld [vmem:[%s1815_s15 + $0x78] sm:$0xff]  ;;  %v243_v30 = vld [vmem:[%s1815_s15 + $0x80] sm:$0xff]  ;;  %v244_v31 = vld [vmem:[%s1815_s15 + $0x88] sm:$0xff] }
  0x1e   : > { %1513 = vmatprep.subr.bf16.mxu0 %v1650_v3  ;;  %1595 = vmatprep.subr.bf16.mxu1 %v1653_v21  ;;  %v298_v33 = vpack.c.bf16 %v242_v29, %v241_v28  ;;  %v299_v34 = vpack.c.bf16 %v244_v31, %v243_v30  ;;  %v245_v35 = vld [vmem:[%s1815_s15 + $0x90] sm:$0xff]  ;;  %v246_v36 = vld [vmem:[%s1815_s15 + $0x98] sm:$0xff]  ;;  %v247_v37 = vld [vmem:[%s1815_s15 + $0xa0] sm:$0xff] }
  0x1f   : > { %v248_v38 = vld [vmem:[%s1815_s15 + $0xa8] sm:$0xff]  ;;  %v300_v39 = vpack.c.bf16 %v246_v36, %v245_v35  ;;  %v249_v41 = vld [vmem:[%s1815_s15 + $0xb0] sm:$0xff]  ;;  %v250_v42 = vld [vmem:[%s1815_s15 + $0xb8] sm:$0xff] }
  0x20   : > { %1603 = vmatpush3.bf16.msra.mxu1 %v1653_v21  ;;  %v301_v40 = vpack.c.bf16 %v248_v38, %v247_v37  ;;  %v251_v43 = vld [vmem:[%s1815_s15 + $0xc0] sm:$0xff]  ;;  %v252_v44 = vld [vmem:[%s1815_s15 + $0xc8] sm:$0xff]  ;;  %v302_v45 = vpack.c.bf16 %v250_v42, %v249_v41  ;;  %v253_v47 = vld [vmem:[%s1815_s15 + $0xd0] sm:$0xff] }
  0x21   : > { %1514 = vmatpush3.bf16.msra.mxu0 %v1650_v3  ;;  %1596 = vmatprep.subr.bf16.mxu1 %v1654_v32  ;;  %v303_v46 = vpack.c.bf16 %v252_v44, %v251_v43  ;;  %v254_v48 = vld [vmem:[%s1815_s15 + $0xd8] sm:$0xff]  ;;  %v255_v49 = vld [vmem:[%s1815_s15 + $0xe0] sm:$0xff]  ;;  %v256_v50 = vld [vmem:[%s1815_s15 + $0xe8] sm:$0xff] }
  0x22   : > { %1515 = vmatprep.subr.bf16.mxu0 %v1651_v13  ;;  %v304_v51 = vpack.c.bf16 %v254_v48, %v253_v47  ;;  %v305_v52 = vpack.c.bf16 %v256_v50, %v255_v49  ;;  %v257_v53 = vld [vmem:[%s1815_s15 + $0xf0] sm:$0xff]  ;;  %v258_v54 = vld [vmem:[%s1815_s15 + $0xf8] sm:$0xff]  ;;  %v259_v55 = vld [vmem:[%s1815_s15 + $0x100] sm:$0xff] }
  0x23   : > { %v260_v56 = vld [vmem:[%s1815_s15 + $0x108] sm:$0xff]  ;;  %v306_v57 = vpack.c.bf16 %v258_v54, %v257_v53  ;;  %v261_v59 = vld [vmem:[%s1815_s15 + $0x110] sm:$0xff]  ;;  %v262_v60 = vld [vmem:[%s1815_s15 + $0x118] sm:$0xff] }
  0x24   : > { %1452 = vmatmul.mubr.msk.bf16.gmra.mrb[4].mxu0 %vm331_vm1, %v294_v19  ;;  %1604 = vmatpush3.bf16.msra.mxu1 %v1654_v32  ;;  %v307_v58 = vpack.c.bf16 %v260_v56, %v259_v55  ;;  %v263_v61 = vld [vmem:[%s1815_s15 + $0x120] sm:$0xff]  ;;  %v264_v62 = vld [vmem:[%s1815_s15 + $0x128] sm:$0xff]  ;;  %v308_v63 = vpack.c.bf16 %v262_v60, %v261_v59  ;;  %v265_v1 = vld [vmem:[%s1815_s15 + $0x130] sm:$0xff] }
  0x25   : > { %1455 = vmatprep.mubr.msk.bf16.mxu0 %vm331_vm1, %v295_v20  ;;  %1516 = vmatpush3.bf16.msra.mxu0 %v1651_v13  ;;  %v309_v0 = vpack.c.bf16 %v264_v62, %v263_v61  ;;  %v266_v2 = vld [vmem:[%s1815_s15 + $0x138] sm:$0xff]  ;;  %v267_v3 = vld [vmem:[%s1815_s15 + $0x140] sm:$0xff]  ;;  %v268_v4 = vld [vmem:[%s1815_s15 + $0x148] sm:$0xff] }
  0x26   : > { %1517 = vmatprep.subr.bf16.mxu0 %v1652_v18  ;;  %v310_v5 = vpack.c.bf16 %v266_v2, %v265_v1  ;;  %v311_v6 = vpack.c.bf16 %v268_v4, %v267_v3  ;;  %v269_v7 = vld [vmem:[%s1815_s15 + $0x150] sm:$0xff]  ;;  %v270_v8 = vld [vmem:[%s1815_s15 + $0x158] sm:$0xff]  ;;  %v271_v9 = vld [vmem:[%s1815_s15 + $0x160] sm:$0xff] }
  0x27   : > { %v272_v10 = vld [vmem:[%s1815_s15 + $0x168] sm:$0xff]  ;;  %v312_v11 = vpack.c.bf16 %v270_v8, %v269_v7  ;;  %v273_v13 = vld [vmem:[%s1815_s15 + $0x170] sm:$0xff]  ;;  %v274_v14 = vld [vmem:[%s1815_s15 + $0x178] sm:$0xff] }
  0x28   : > { %v313_v12 = vpack.c.bf16 %v272_v10, %v271_v9  ;;  %v275_v15 = vld [vmem:[%s1815_s15 + $0x180] sm:$0xff]  ;;  %v276_v16 = vld [vmem:[%s1815_s15 + $0x188] sm:$0xff]  ;;  %v314_v17 = vpack.c.bf16 %v274_v14, %v273_v13  ;;  %v1656_v20 = vld [vmem:[%s2193_s3 + $0x38] sm:$0xff]  }
  0x29   : > { %1518 = vmatpush3.bf16.msra.mxu0 %v1652_v18  ;;  %v1655_v18 = vld [vmem:[%s2193_s3 + $0x30] sm:$0xff]   ;;  %v315_v19 = vpack.c.bf16 %v276_v16, %v275_v15  ;;  %v278_v22 = vld [vmem:[%s1815_s15 + $0x198] sm:$0xff]  ;;  %v279_v23 = vld [vmem:[%s1815_s15 + $0x1a0] sm:$0xff] }
  0x2a   : > { %1519 = vmatprep.subr.bf16.mxu0 %v1653_v21  ;;  %1597 = vmatprep.subr.bf16.mxu1 %v1655_v18  ;;  %v280_v24 = vld [vmem:[%s1815_s15 + $0x1a8] sm:$0xff]  ;;  %v282_v28 = vld [vmem:[%s1815_s15 + $0x1b8] sm:$0xff]  ;;  %v283_v29 = vld [vmem:[%s1815_s15 + $0x1c0] sm:$0xff] }
  0x2b   : > { %1605 = vmatpush3.bf16.msra.mxu1 %v1655_v18  ;;  %v284_v30 = vld [vmem:[%s1815_s15 + $0x1c8] sm:$0xff]  ;;  %v287_v35 = vld [vmem:[%s1815_s15 + $0x1e0] sm:$0xff] }
  0x2c   : > { %1456 = vmatmul.mubr.msk.bf16.gmra.mrb[8].mxu0 %vm331_vm1, %v296_v26  ;;  %1598 = vmatprep.subr.bf16.mxu1 %v1656_v20  ;;  %v317_v26 = vpack.c.bf16 %v280_v24, %v279_v23  ;;  %v288_v36 = vld [vmem:[%s1815_s15 + $0x1e8] sm:$0xff]  ;;  %v1934_v42 = vld [vmem:[%s2192_s2] ss:$0 sm:$0xff] }
  0x2d   : > { %1459 = vmatprep.mubr.msk.bf16.mxu0 %vm331_vm1, %v297_v27  ;;  %1520 = vmatpush3.bf16.msra.mxu0 %v1653_v21  ;;  %v277_v21 = vld [vmem:[%s1815_s15 + $0x190] sm:$0xff]  ;;  %v321_v38 = vpack.c.bf16 %v288_v36, %v287_v35 }
  0x2e   : > { %1521 = vmatprep.subr.bf16.mxu0 %v1654_v32  ;;  %v316_v25 = vpack.c.bf16 %v278_v22, %v277_v21  ;;  %v281_v27 = vld [vmem:[%s1815_s15 + $0x1b0] sm:$0xff] }
  0x2f   : > { %1606 = vmatpush3.bf16.msra.mxu1 %v1656_v20  ;;  %v318_v31 = vpack.c.bf16 %v282_v28, %v281_v27 }
  0x31   : > { %1522 = vmatpush3.bf16.msra.mxu0 %v1654_v32  ;;  %v319_v32 = vpack.c.bf16 %v284_v30, %v283_v29 }
  0x32   : > { %1523 = vmatprep.subr.bf16.mxu0 %v1655_v18 }
  0x34   : > { %1460 = vmatmul.mubr.msk.bf16.gmra.mrb[12].mxu0 %vm331_vm1, %v298_v33  ;;  %v285_v33 = vld [vmem:[%s1815_s15 + $0x1d0] sm:$0xff] }
  0x35   : > { %1463 = vmatprep.mubr.msk.bf16.mxu0 %vm331_vm1, %v299_v34  ;;  %1524 = vmatpush3.bf16.msra.mxu0 %v1655_v18  ;;  %v286_v34 = vld [vmem:[%s1815_s15 + $0x1d8] sm:$0xff] }
  0x36   : > { %1525 = vmatprep.subr.bf16.mxu0 %v1656_v20  ;;  %v320_v37 = vpack.c.bf16 %v286_v34, %v285_v33 }
  0x39   : > { %1526 = vmatpush3.bf16.msra.mxu0 %v1656_v20 }
  0x3c   : > { %1464 = vmatmul.mubr.msk.bf16.gmra.mrb[16].mxu0 %vm331_vm1, %v300_v39  ;;  %v289_v39 = vld [vmem:[%s1815_s15 + $0x1f0] sm:$0xff] }
  0x3d   : > { %1467 = vmatprep.mubr.msk.bf16.mxu0 %vm331_vm1, %v301_v40  ;;  %v290_v40 = vld [vmem:[%s1815_s15 + $0x1f8] sm:$0xff]  ;;  %s1321_s15 = sshll.u32 %s216_s14, 9 }
  0x3e   : > { %v322_v41 = vpack.c.bf16 %v290_v40, %v289_v39  ;;  %s2010_s23 = scalar_lea.vmem [#allocation2], %s1321_s15 }
  0x3f   : > { %s1255_s26 = sshll.u32 %s2010_s23, 4  ;;  %s2141_s26 = int_to_ptr.vmem [resolvable:$true] %s1255_s26 }
  0x40   : > { %s1657_s8 = scalar_lea.vmem %s2141_s26, 8192  ;;  %p1664_p0 = scmp.lt.s32.totalorder %s2141_s26, %s1662_s10 }
  0x41   : > { %p1658_p11 = scmp.ne.s32.totalorder %s2141_s26, %s1657_s8  ;;  %p1665_p1 = scmp.lt.s32.totalorder %s1663_s11, %s1657_s8 }
  0x43   : > { %p1659_p12 = pnand %p1658_p11, %p1792_p5  ;;  %p1666_p2 = por %p1665_p1, %p1664_p0 }
  0x44   : > { %1468 = vmatmul.mubr.msk.bf16.gmra.mrb[20].mxu0 %vm331_vm1, %v302_v45 }
  0x45   : > { %1471 = vmatprep.mubr.msk.bf16.mxu0 %vm331_vm1, %v303_v46  ;;  %p1660_p13 = pneg %p1659_p12 }
  0x47   : > { %p1667_p3 = pnand %p1666_p2, %p1660_p13 }
  0x4c   : > { %1472 = vmatmul.mubr.msk.bf16.gmra.mrb[24].mxu0 %vm331_vm1, %v304_v51 }
  0x4d   : > { %1475 = vmatprep.mubr.msk.bf16.mxu0 %vm331_vm1, %v305_v52 }
  0x54   : > { %1476 = vmatmul.mubr.msk.bf16.gmra.mrb[28].mxu0 %vm331_vm1, %v306_v57 }
  0x55   : > { %1479 = vmatprep.mubr.msk.bf16.mxu0 %vm331_vm1, %v307_v58 }
  0x5c   : > { %1480 = vmatmul.mubr.msk.bf16.gmra.mrb[32].mxu0 %vm331_vm1, %v308_v63 }
  0x5d   : > { %1483 = vmatprep.mubr.msk.bf16.mxu0 %vm331_vm1, %v309_v0 }
  0x64   : > { %1484 = vmatmul.mubr.msk.bf16.gmra.mrb[36].mxu0 %vm331_vm1, %v310_v5 }
  0x65   : > { %1487 = vmatprep.mubr.msk.bf16.mxu0 %vm331_vm1, %v311_v6 }
  0x6c   : > { %1488 = vmatmul.mubr.msk.bf16.gmra.mrb[40].mxu0 %vm331_vm1, %v312_v11 }
  0x6d   : > { %1491 = vmatprep.mubr.msk.bf16.mxu0 %vm331_vm1, %v313_v12 }
  0x74   : > { %1492 = vmatmul.mubr.msk.bf16.gmra.mrb[44].mxu0 %vm331_vm1, %v314_v17 }
  0x75   : > { %1495 = vmatprep.mubr.msk.bf16.mxu0 %vm331_vm1, %v315_v19 }
  0x7c   : > { %1496 = vmatmul.mubr.msk.bf16.gmra.mrb[48].mxu0 %vm331_vm1, %v316_v25 }
  0x7d   : > { %1499 = vmatprep.mubr.msk.bf16.mxu0 %vm331_vm1, %v317_v26 }
  0x84   : > { %1500 = vmatmul.mubr.msk.bf16.gmra.mrb[52].mxu0 %vm331_vm1, %v318_v31 }
  0x85   : > { %1503 = vmatprep.mubr.msk.bf16.mxu0 %vm331_vm1, %v319_v32 }
  0x8c   : > { %1504 = vmatmul.mubr.msk.bf16.gmra.mrb[56].mxu0 %vm331_vm1, %v320_v37 }
  0x8d   : > { %1507 = vmatprep.mubr.msk.bf16.mxu0 %vm331_vm1, %v321_v38 }
  0x94   : > { %1508 = vmatmul.mubr.msk.bf16.gmra.mrb[60].mxu0 %vm331_vm1, %v322_v41 }
  0xef   : > { %v1449_v43 = vpop.f32.mrb[0].mxu0 }
  0xf0   : > { %v475_v44 = vadd.f32 %v1449_v43, %v1934_v42  ;;  %v466_v45 = vpop.f32.mrb[1].mxu0 }
  0xf1   : > { %v467_v46 = vadd.f32 %v1934_v42, %v466_v45  ;;  %v1450_v47 = vpop.f32.mrb[2].mxu0 }
  0xf2   : > { %v478_v48 = vadd.f32 %v1450_v47, %v1934_v42  ;;  %v469_v49 = vpop.f32.mrb[3].mxu0  ;;  %v723_v51 = vmax.f32 %v475_v44, 0.0 }
  0xf3   : > { %v470_v50 = vadd.f32 %v1934_v42, %v469_v49  ;;  %v721_v53 = vmax.f32 %v467_v46, 0.0 }
  0xf4   : > { %v724_v52 = vmax.f32 %v478_v48, 0.0 }
  0xf5   : > { %v722_v54 = vmax.f32 %v470_v50, 0.0 }
  0xf6   : > { %v786_v55 = vpack.c.bf16 %v724_v52, %v723_v51 }
  0xf7   : > { %v785_v56 = vpack.c.bf16 %v722_v54, %v721_v53  ;;  %v1453_v57 = vpop.f32.mrb[4].mxu0 }
  0xf8   : > { %v491_v58 = vadd.f32 %v1453_v57, %v1934_v42  ;;  %v482_v59 = vpop.f32.mrb[5].mxu0 }
  0xf9   : > { %v483_v60 = vadd.f32 %v1934_v42, %v482_v59  ;;  %v1454_v61 = vpop.f32.mrb[6].mxu0  ;;  %1527 = vmatprep.mubr.bf16.mxu0 %v785_v56 }
  0xfa   : > { %v494_v62 = vadd.f32 %v1454_v61, %v1934_v42  ;;  %v485_v63 = vpop.f32.mrb[7].mxu0  ;;  %1528 = vmatmul.mubr.bf16.vlgmr.msra.gmra.mrb[64].mxu0 %v786_v55  ;;  %v727_v1 = vmax.f32 %v491_v58, 0.0 }
  0xfb   : > { %v486_v0 = vadd.f32 %v1934_v42, %v485_v63  ;;  %v725_v3 = vmax.f32 %v483_v60, 0.0 }
  0xfc   : > { %v728_v2 = vmax.f32 %v494_v62, 0.0 }
  0xfd   : > { %v726_v4 = vmax.f32 %v486_v0, 0.0 }
  0xfe   : > { %v788_v5 = vpack.c.bf16 %v728_v2, %v727_v1 }
  0xff   : > { %v1457_v6 = vpop.f32.mrb[8].mxu0  ;;  %v787_v7 = vpack.c.bf16 %v726_v4, %v725_v3 }
 0x100   : > { %v507_v8 = vadd.f32 %v1457_v6, %v1934_v42  ;;  %v498_v9 = vpop.f32.mrb[9].mxu0 }
 0x101   : > { %v499_v10 = vadd.f32 %v1934_v42, %v498_v9  ;;  %v1458_v11 = vpop.f32.mrb[10].mxu0  ;;  %1531 = vmatprep.mubr.bf16.mxu1 %v787_v7 }
 0x102   : > { %v510_v12 = vadd.f32 %v1458_v11, %v1934_v42  ;;  %v501_v13 = vpop.f32.mrb[11].mxu0  ;;  %1532 = vmatmul.mubr.bf16.vlgmr.msra.gmra.mrb[0].mxu1 %v788_v5  ;;  %v731_v15 = vmax.f32 %v507_v8, 0.0 }
 0x103   : > { %v502_v14 = vadd.f32 %v1934_v42, %v501_v13  ;;  %v729_v17 = vmax.f32 %v499_v10, 0.0 }
 0x104   : > { %v732_v16 = vmax.f32 %v510_v12, 0.0 }
 0x105   : > { %v730_v18 = vmax.f32 %v502_v14, 0.0 }
 0x106   : > { %v790_v19 = vpack.c.bf16 %v732_v16, %v731_v15 }
 0x107   : > { %v789_v20 = vpack.c.bf16 %v730_v18, %v729_v17  ;;  %v1461_v21 = vpop.f32.mrb[12].mxu0 }
 0x108   : > { %v523_v22 = vadd.f32 %v1461_v21, %v1934_v42  ;;  %v514_v23 = vpop.f32.mrb[13].mxu0 }
 0x109   : > { %v515_v24 = vadd.f32 %v1934_v42, %v514_v23  ;;  %v1462_v25 = vpop.f32.mrb[14].mxu0  ;;  %1535 = vmatprep.mubr.bf16.mxu1 %v789_v20 }
 0x10a   : > { %v526_v26 = vadd.f32 %v1462_v25, %v1934_v42  ;;  %v517_v27 = vpop.f32.mrb[15].mxu0  ;;  %1536 = vmatmul.mubr.bf16.gmra.mrb[4].mxu1 %v790_v19  ;;  %v735_v29 = vmax.f32 %v523_v22, 0.0 }
 0x10b   : > { %v518_v28 = vadd.f32 %v1934_v42, %v517_v27  ;;  %v733_v31 = vmax.f32 %v515_v24, 0.0 }
 0x10c   : > { %v736_v30 = vmax.f32 %v526_v26, 0.0 }
 0x10d   : > { %v734_v32 = vmax.f32 %v518_v28, 0.0 }
 0x10e   : > { %v792_v33 = vpack.c.bf16 %v736_v30, %v735_v29 }
 0x10f   : > { %v791_v34 = vpack.c.bf16 %v734_v32, %v733_v31  ;;  %v1465_v35 = vpop.f32.mrb[16].mxu0 }
 0x110   : > { %v539_v36 = vadd.f32 %v1465_v35, %v1934_v42  ;;  %v530_v37 = vpop.f32.mrb[17].mxu0 }
 0x111   : > { %v531_v38 = vadd.f32 %v1934_v42, %v530_v37  ;;  %v1466_v39 = vpop.f32.mrb[18].mxu0  ;;  %1539 = vmatprep.mubr.bf16.mxu1 %v791_v34 }
 0x112   : > { %v542_v40 = vadd.f32 %v1466_v39, %v1934_v42  ;;  %v533_v41 = vpop.f32.mrb[19].mxu0  ;;  %1540 = vmatmul.mubr.bf16.gmra.mrb[8].mxu1 %v792_v33  ;;  %v739_v44 = vmax.f32 %v539_v36, 0.0 }
 0x113   : > { %v534_v43 = vadd.f32 %v1934_v42, %v533_v41  ;;  %v737_v46 = vmax.f32 %v531_v38, 0.0 }
 0x114   : > { %v740_v45 = vmax.f32 %v542_v40, 0.0 }
 0x115   : > { %v738_v47 = vmax.f32 %v534_v43, 0.0 }
 0x116   : > { %v794_v48 = vpack.c.bf16 %v740_v45, %v739_v44 }
 0x117   : > { %v793_v49 = vpack.c.bf16 %v738_v47, %v737_v46  ;;  %v1469_v50 = vpop.f32.mrb[20].mxu0 }
 0x118   : > { %v555_v51 = vadd.f32 %v1469_v50, %v1934_v42  ;;  %v546_v52 = vpop.f32.mrb[21].mxu0 }
 0x119   : > { %v547_v53 = vadd.f32 %v1934_v42, %v546_v52  ;;  %v1470_v54 = vpop.f32.mrb[22].mxu0  ;;  %1543 = vmatprep.mubr.bf16.mxu1 %v793_v49 }
 0x11a   : > { %v558_v55 = vadd.f32 %v1470_v54, %v1934_v42  ;;  %v549_v56 = vpop.f32.mrb[23].mxu0  ;;  %1544 = vmatmul.mubr.bf16.gmra.mrb[12].mxu1 %v794_v48  ;;  %v743_v58 = vmax.f32 %v555_v51, 0.0 }
 0x11b   : > { %v550_v57 = vadd.f32 %v1934_v42, %v549_v56  ;;  %v741_v60 = vmax.f32 %v547_v53, 0.0 }
 0x11c   : > { %v744_v59 = vmax.f32 %v558_v55, 0.0 }
 0x11d   : > { %v742_v61 = vmax.f32 %v550_v57, 0.0 }
 0x11e   : > { %v796_v62 = vpack.c.bf16 %v744_v59, %v743_v58 }
 0x11f   : > { %v795_v63 = vpack.c.bf16 %v742_v61, %v741_v60  ;;  %v1473_v0 = vpop.f32.mrb[24].mxu0 }
 0x120   : > { %v571_v1 = vadd.f32 %v1473_v0, %v1934_v42  ;;  %v562_v2 = vpop.f32.mrb[25].mxu0 }
 0x121   : > { %v563_v3 = vadd.f32 %v1934_v42, %v562_v2  ;;  %v1474_v4 = vpop.f32.mrb[26].mxu0  ;;  %1547 = vmatprep.mubr.bf16.mxu1 %v795_v63 }
 0x122   : > { %v574_v5 = vadd.f32 %v1474_v4, %v1934_v42  ;;  %v565_v6 = vpop.f32.mrb[27].mxu0  ;;  %1548 = vmatmul.mubr.bf16.gmra.mrb[16].mxu1 %v796_v62  ;;  %v747_v8 = vmax.f32 %v571_v1, 0.0 }
 0x123   : > { %v566_v7 = vadd.f32 %v1934_v42, %v565_v6  ;;  %v745_v10 = vmax.f32 %v563_v3, 0.0 }
 0x124   : > { %v748_v9 = vmax.f32 %v574_v5, 0.0 }
 0x125   : > { %v746_v11 = vmax.f32 %v566_v7, 0.0 }
 0x126   : > { %v798_v12 = vpack.c.bf16 %v748_v9, %v747_v8 }
 0x127   : > { %v797_v13 = vpack.c.bf16 %v746_v11, %v745_v10  ;;  %v1477_v14 = vpop.f32.mrb[28].mxu0 }
 0x128   : > { %v587_v15 = vadd.f32 %v1477_v14, %v1934_v42  ;;  %v578_v16 = vpop.f32.mrb[29].mxu0 }
 0x129   : > { %v579_v17 = vadd.f32 %v1934_v42, %v578_v16  ;;  %v1478_v18 = vpop.f32.mrb[30].mxu0  ;;  %1551 = vmatprep.mubr.bf16.mxu1 %v797_v13 }
 0x12a   : > { %v590_v19 = vadd.f32 %v1478_v18, %v1934_v42  ;;  %v581_v20 = vpop.f32.mrb[31].mxu0  ;;  %1552 = vmatmul.mubr.bf16.gmra.mrb[20].mxu1 %v798_v12  ;;  %v751_v22 = vmax.f32 %v587_v15, 0.0 }
 0x12b   : > { %v582_v21 = vadd.f32 %v1934_v42, %v581_v20  ;;  %v749_v24 = vmax.f32 %v579_v17, 0.0 }
 0x12c   : > { %v752_v23 = vmax.f32 %v590_v19, 0.0 }
 0x12d   : > { %v750_v25 = vmax.f32 %v582_v21, 0.0 }
 0x12e   : > { %v800_v26 = vpack.c.bf16 %v752_v23, %v751_v22 }
 0x12f   : > { %v799_v27 = vpack.c.bf16 %v750_v25, %v749_v24  ;;  %v1481_v28 = vpop.f32.mrb[32].mxu0 }
 0x130   : > { %v603_v29 = vadd.f32 %v1481_v28, %v1934_v42  ;;  %v594_v30 = vpop.f32.mrb[33].mxu0 }
 0x131   : > { %v595_v31 = vadd.f32 %v1934_v42, %v594_v30  ;;  %v1482_v32 = vpop.f32.mrb[34].mxu0  ;;  %1555 = vmatprep.mubr.bf16.mxu1 %v799_v27 }
 0x132   : > { %v606_v33 = vadd.f32 %v1482_v32, %v1934_v42  ;;  %v597_v34 = vpop.f32.mrb[35].mxu0  ;;  %1556 = vmatmul.mubr.bf16.gmra.mrb[24].mxu1 %v800_v26  ;;  %v755_v36 = vmax.f32 %v603_v29, 0.0 }
 0x133   : > { %v598_v35 = vadd.f32 %v1934_v42, %v597_v34  ;;  %v753_v38 = vmax.f32 %v595_v31, 0.0 }
 0x134   : > { %v756_v37 = vmax.f32 %v606_v33, 0.0 }
 0x135   : > { %v754_v39 = vmax.f32 %v598_v35, 0.0 }
 0x136   : > { %v802_v40 = vpack.c.bf16 %v756_v37, %v755_v36 }
 0x137   : > { %v801_v41 = vpack.c.bf16 %v754_v39, %v753_v38  ;;  %v1485_v43 = vpop.f32.mrb[36].mxu0 }
 0x138   : > { %v619_v44 = vadd.f32 %v1485_v43, %v1934_v42  ;;  %v610_v45 = vpop.f32.mrb[37].mxu0 }
 0x139   : > { %v611_v46 = vadd.f32 %v1934_v42, %v610_v45  ;;  %v1486_v47 = vpop.f32.mrb[38].mxu0  ;;  %1559 = vmatprep.mubr.bf16.mxu1 %v801_v41 }
 0x13a   : > { %v622_v48 = vadd.f32 %v1486_v47, %v1934_v42  ;;  %v613_v49 = vpop.f32.mrb[39].mxu0  ;;  %1560 = vmatmul.mubr.bf16.gmra.mrb[28].mxu1 %v802_v40  ;;  %v759_v51 = vmax.f32 %v619_v44, 0.0 }
 0x13b   : > { %v614_v50 = vadd.f32 %v1934_v42, %v613_v49  ;;  %v757_v53 = vmax.f32 %v611_v46, 0.0 }
 0x13c   : > { %v760_v52 = vmax.f32 %v622_v48, 0.0 }
 0x13d   : > { %v758_v54 = vmax.f32 %v614_v50, 0.0 }
 0x13e   : > { %v804_v55 = vpack.c.bf16 %v760_v52, %v759_v51 }
 0x13f   : > { %v803_v56 = vpack.c.bf16 %v758_v54, %v757_v53  ;;  %v1489_v57 = vpop.f32.mrb[40].mxu0 }
 0x140   : > { %v635_v58 = vadd.f32 %v1489_v57, %v1934_v42  ;;  %v626_v59 = vpop.f32.mrb[41].mxu0 }
 0x141   : > { %v627_v60 = vadd.f32 %v1934_v42, %v626_v59  ;;  %v1490_v61 = vpop.f32.mrb[42].mxu0  ;;  %1563 = vmatprep.mubr.bf16.mxu1 %v803_v56 }
 0x142   : > { %v638_v62 = vadd.f32 %v1490_v61, %v1934_v42  ;;  %v629_v63 = vpop.f32.mrb[43].mxu0  ;;  %1564 = vmatmul.mubr.bf16.gmra.mrb[32].mxu1 %v804_v55  ;;  %v763_v1 = vmax.f32 %v635_v58, 0.0 }
 0x143   : > { %v630_v0 = vadd.f32 %v1934_v42, %v629_v63  ;;  %v761_v3 = vmax.f32 %v627_v60, 0.0 }
 0x144   : > { %v764_v2 = vmax.f32 %v638_v62, 0.0 }
 0x145   : > { %v762_v4 = vmax.f32 %v630_v0, 0.0 }
 0x146   : > { %v806_v5 = vpack.c.bf16 %v764_v2, %v763_v1 }
 0x147   : > { %v805_v6 = vpack.c.bf16 %v762_v4, %v761_v3  ;;  %v1493_v7 = vpop.f32.mrb[44].mxu0 }
 0x148   : > { %v651_v8 = vadd.f32 %v1493_v7, %v1934_v42  ;;  %v642_v9 = vpop.f32.mrb[45].mxu0 }
 0x149   : > { %v643_v10 = vadd.f32 %v1934_v42, %v642_v9  ;;  %v1494_v11 = vpop.f32.mrb[46].mxu0  ;;  %1567 = vmatprep.mubr.bf16.mxu1 %v805_v6 }
 0x14a   : > { %v654_v12 = vadd.f32 %v1494_v11, %v1934_v42  ;;  %v645_v13 = vpop.f32.mrb[47].mxu0  ;;  %1568 = vmatmul.mubr.bf16.gmra.mrb[36].mxu1 %v806_v5  ;;  %v767_v15 = vmax.f32 %v651_v8, 0.0 }
 0x14b   : > { %v646_v14 = vadd.f32 %v1934_v42, %v645_v13  ;;  %v765_v17 = vmax.f32 %v643_v10, 0.0 }
 0x14c   : > { %v768_v16 = vmax.f32 %v654_v12, 0.0 }
 0x14d   : > { %v766_v18 = vmax.f32 %v646_v14, 0.0  ;;  %v2006_v14 = vld [vmem:[%s2194_s4] ss:$0 sm:$0xff] }
 0x14e   : > { %v808_v19 = vpack.c.bf16 %v768_v16, %v767_v15 }
 0x14f   : > { %v807_v20 = vpack.c.bf16 %v766_v18, %v765_v17  ;;  %v1497_v21 = vpop.f32.mrb[48].mxu0 }
 0x150   : > { %v667_v22 = vadd.f32 %v1497_v21, %v1934_v42  ;;  %v658_v23 = vpop.f32.mrb[49].mxu0 }
 0x151   : > { %v659_v24 = vadd.f32 %v1934_v42, %v658_v23  ;;  %v1498_v25 = vpop.f32.mrb[50].mxu0  ;;  %1571 = vmatprep.mubr.bf16.mxu1 %v807_v20 }
 0x152   : > { %v670_v26 = vadd.f32 %v1498_v25, %v1934_v42  ;;  %v661_v27 = vpop.f32.mrb[51].mxu0  ;;  %1572 = vmatmul.mubr.bf16.gmra.mrb[40].mxu1 %v808_v19  ;;  %v771_v29 = vmax.f32 %v667_v22, 0.0 }
 0x153   : > { %v662_v28 = vadd.f32 %v1934_v42, %v661_v27  ;;  %v769_v31 = vmax.f32 %v659_v24, 0.0 }
 0x154   : > { %v772_v30 = vmax.f32 %v670_v26, 0.0 }
 0x155   : > { %v770_v32 = vmax.f32 %v662_v28, 0.0 }
 0x156   : > { %v810_v33 = vpack.c.bf16 %v772_v30, %v771_v29 }
 0x157   : > { %v809_v34 = vpack.c.bf16 %v770_v32, %v769_v31  ;;  %v1501_v35 = vpop.f32.mrb[52].mxu0 }
 0x158   : > { %v683_v36 = vadd.f32 %v1501_v35, %v1934_v42  ;;  %v674_v37 = vpop.f32.mrb[53].mxu0 }
 0x159   : > { %v675_v38 = vadd.f32 %v1934_v42, %v674_v37  ;;  %v1502_v39 = vpop.f32.mrb[54].mxu0  ;;  %1575 = vmatprep.mubr.bf16.mxu1 %v809_v34 }
 0x15a   : > { %v686_v40 = vadd.f32 %v1502_v39, %v1934_v42  ;;  %v677_v41 = vpop.f32.mrb[55].mxu0  ;;  %1576 = vmatmul.mubr.bf16.gmra.mrb[44].mxu1 %v810_v33  ;;  %v775_v44 = vmax.f32 %v683_v36, 0.0 }
 0x15b   : > { %v678_v43 = vadd.f32 %v1934_v42, %v677_v41  ;;  %v773_v46 = vmax.f32 %v675_v38, 0.0 }
 0x15c   : > { %v776_v45 = vmax.f32 %v686_v40, 0.0 }
 0x15d   : > { %v774_v47 = vmax.f32 %v678_v43, 0.0 }
 0x15e   : > { %v812_v48 = vpack.c.bf16 %v776_v45, %v775_v44 }
 0x15f   : > { %v811_v49 = vpack.c.bf16 %v774_v47, %v773_v46  ;;  %v1505_v50 = vpop.f32.mrb[56].mxu0 }
 0x160   : > { %v699_v51 = vadd.f32 %v1505_v50, %v1934_v42  ;;  %v690_v52 = vpop.f32.mrb[57].mxu0 }
 0x161   : > { %v691_v53 = vadd.f32 %v1934_v42, %v690_v52  ;;  %v1506_v54 = vpop.f32.mrb[58].mxu0  ;;  %1579 = vmatprep.mubr.bf16.mxu1 %v811_v49 }
 0x162   : > { %v702_v55 = vadd.f32 %v1506_v54, %v1934_v42  ;;  %v693_v56 = vpop.f32.mrb[59].mxu0  ;;  %1580 = vmatmul.mubr.bf16.gmra.mrb[48].mxu1 %v812_v48  ;;  %v779_v58 = vmax.f32 %v699_v51, 0.0 }
 0x163   : > { %v694_v57 = vadd.f32 %v1934_v42, %v693_v56  ;;  %v777_v60 = vmax.f32 %v691_v53, 0.0 }
 0x164   : > { %v780_v59 = vmax.f32 %v702_v55, 0.0 }
 0x165   : > { %v778_v61 = vmax.f32 %v694_v57, 0.0 }
 0x166   : > { %v814_v62 = vpack.c.bf16 %v780_v59, %v779_v58 }
 0x167   : > { %v813_v63 = vpack.c.bf16 %v778_v61, %v777_v60  ;;  %v1509_v0 = vpop.f32.mrb[60].mxu0 }
 0x168   : > { %v715_v1 = vadd.f32 %v1509_v0, %v1934_v42  ;;  %v706_v2 = vpop.f32.mrb[61].mxu0 }
 0x169   : > { %v707_v3 = vadd.f32 %v1934_v42, %v706_v2  ;;  %v1510_v4 = vpop.f32.mrb[62].mxu0  ;;  %1583 = vmatprep.mubr.bf16.mxu1 %v813_v63 }
 0x16a   : > { %v718_v5 = vadd.f32 %v1510_v4, %v1934_v42  ;;  %v709_v6 = vpop.f32.mrb[63].mxu0  ;;  %1584 = vmatmul.mubr.bf16.gmra.mrb[52].mxu1 %v814_v62  ;;  %v783_v8 = vmax.f32 %v715_v1, 0.0 }
 0x16b   : > { %v710_v7 = vadd.f32 %v1934_v42, %v709_v6  ;;  %v781_v10 = vmax.f32 %v707_v3, 0.0 }
 0x16c   : > { %v784_v9 = vmax.f32 %v718_v5, 0.0 }
 0x16d   : > { %v782_v11 = vmax.f32 %v710_v7, 0.0 }
 0x16e   : > { %v816_v12 = vpack.c.bf16 %v784_v9, %v783_v8 }
 0x16f   : > { %v815_v13 = vpack.c.bf16 %v782_v11, %v781_v10 }
 0x171   : > { %1587 = vmatprep.mubr.bf16.mxu1 %v815_v13 }
 0x172   : > { %1588 = vmatmul.mubr.bf16.gmra.mrb[56].mxu1 %v816_v12 }
 0x1cd   : > { %v1529_v15 = vpop.f32.mrb[64].mxu0 }
 0x1ce   : > { %v931_v16 = vadd.f32 %v1529_v15, %v2006_v14  ;;  %v922_v42 = vpop.f32.mrb[65].mxu0 }
 0x1cf   : > { %v923_v17 = vadd.f32 %v2006_v14, %v922_v42  ;;  %v1530_v18 = vpop.f32.mrb[66].mxu0 }
 0x1d0   : > { %1179 = vst [vmem:[%s2010_s23 + $0x10] sm:$0xff] %v931_v16  ;;  %v934_v19 = vadd.f32 %v1530_v18, %v2006_v14  ;;  %v925_v20 = vpop.f32.mrb[67].mxu0 }
 0x1d1   : > { %1177 = vst [vmem:[%s2010_s23] sm:$0xff] %v923_v17  ;;  %v926_v21 = vadd.f32 %v2006_v14, %v925_v20 }
 0x1d2   : > { %1180 = vst [vmem:[%s2010_s23 + $0x18] sm:$0xff] %v934_v19 }
 0x1d3   : > { %1178 = vst [vmem:[%s2010_s23 + $0x8] sm:$0xff] %v926_v21 }
 0x1d5   : > { %v1533_v22 = vpop.f32.mrb[0].mxu1 }
 0x1d6   : > { %v947_v23 = vadd.f32 %v1533_v22, %v2006_v14  ;;  %v938_v24 = vpop.f32.mrb[1].mxu1 }
 0x1d7   : > { %v939_v25 = vadd.f32 %v2006_v14, %v938_v24  ;;  %v1534_v26 = vpop.f32.mrb[2].mxu1 }
 0x1d8   : > { %1183 = vst [vmem:[%s2010_s23 + $0x30] sm:$0xff] %v947_v23  ;;  %v950_v27 = vadd.f32 %v1534_v26, %v2006_v14  ;;  %v941_v28 = vpop.f32.mrb[3].mxu1 }
 0x1d9   : > { %1181 = vst [vmem:[%s2010_s23 + $0x20] sm:$0xff] %v939_v25  ;;  %v942_v29 = vadd.f32 %v2006_v14, %v941_v28 }
 0x1da   : > { %1184 = vst [vmem:[%s2010_s23 + $0x38] sm:$0xff] %v950_v27 }
 0x1db   : > { %1182 = vst [vmem:[%s2010_s23 + $0x28] sm:$0xff] %v942_v29 }
 0x1dd   : > { %v1537_v30 = vpop.f32.mrb[4].mxu1 }
 0x1de   : > { %v963_v31 = vadd.f32 %v1537_v30, %v2006_v14  ;;  %v954_v32 = vpop.f32.mrb[5].mxu1 }
 0x1df   : > { %v955_v33 = vadd.f32 %v2006_v14, %v954_v32  ;;  %v1538_v34 = vpop.f32.mrb[6].mxu1 }
 0x1e0   : > { %1187 = vst [vmem:[%s2010_s23 + $0x50] sm:$0xff] %v963_v31  ;;  %v966_v35 = vadd.f32 %v1538_v34, %v2006_v14  ;;  %v957_v36 = vpop.f32.mrb[7].mxu1 }
 0x1e1   : > { %1185 = vst [vmem:[%s2010_s23 + $0x40] sm:$0xff] %v955_v33  ;;  %v958_v37 = vadd.f32 %v2006_v14, %v957_v36 }
 0x1e2   : > { %1188 = vst [vmem:[%s2010_s23 + $0x58] sm:$0xff] %v966_v35 }
 0x1e3   : > { %1186 = vst [vmem:[%s2010_s23 + $0x48] sm:$0xff] %v958_v37 }
 0x1e5   : > { %v1541_v38 = vpop.f32.mrb[8].mxu1 }
 0x1e6   : > { %v979_v39 = vadd.f32 %v1541_v38, %v2006_v14  ;;  %v970_v40 = vpop.f32.mrb[9].mxu1 }
 0x1e7   : > { %v971_v41 = vadd.f32 %v2006_v14, %v970_v40  ;;  %v1542_v43 = vpop.f32.mrb[10].mxu1 }
 0x1e8   : > { %1191 = vst [vmem:[%s2010_s23 + $0x70] sm:$0xff] %v979_v39  ;;  %v982_v44 = vadd.f32 %v1542_v43, %v2006_v14  ;;  %v973_v45 = vpop.f32.mrb[11].mxu1 }
 0x1e9   : > { %1189 = vst [vmem:[%s2010_s23 + $0x60] sm:$0xff] %v971_v41  ;;  %v974_v46 = vadd.f32 %v2006_v14, %v973_v45 }
 0x1ea   : > { %1192 = vst [vmem:[%s2010_s23 + $0x78] sm:$0xff] %v982_v44 }
 0x1eb   : > { %1190 = vst [vmem:[%s2010_s23 + $0x68] sm:$0xff] %v974_v46 }
 0x1ed   : > { %v1545_v47 = vpop.f32.mrb[12].mxu1 }
 0x1ee   : > { %v995_v48 = vadd.f32 %v1545_v47, %v2006_v14  ;;  %v986_v49 = vpop.f32.mrb[13].mxu1 }
 0x1ef   : > { %v987_v50 = vadd.f32 %v2006_v14, %v986_v49  ;;  %v1546_v51 = vpop.f32.mrb[14].mxu1 }
 0x1f0   : > { %1195 = vst [vmem:[%s2010_s23 + $0x90] sm:$0xff] %v995_v48  ;;  %v998_v52 = vadd.f32 %v1546_v51, %v2006_v14  ;;  %v989_v53 = vpop.f32.mrb[15].mxu1 }
 0x1f1   : > { %1193 = vst [vmem:[%s2010_s23 + $0x80] sm:$0xff] %v987_v50  ;;  %v990_v54 = vadd.f32 %v2006_v14, %v989_v53 }
 0x1f2   : > { %1196 = vst [vmem:[%s2010_s23 + $0x98] sm:$0xff] %v998_v52 }
 0x1f3   : > { %1194 = vst [vmem:[%s2010_s23 + $0x88] sm:$0xff] %v990_v54 }
 0x1f5   : > { %v1549_v55 = vpop.f32.mrb[16].mxu1 }
 0x1f6   : > { %v1011_v56 = vadd.f32 %v1549_v55, %v2006_v14  ;;  %v1002_v57 = vpop.f32.mrb[17].mxu1 }
 0x1f7   : > { %v1003_v58 = vadd.f32 %v2006_v14, %v1002_v57  ;;  %v1550_v59 = vpop.f32.mrb[18].mxu1 }
 0x1f8   : > { %1199 = vst [vmem:[%s2010_s23 + $0xb0] sm:$0xff] %v1011_v56  ;;  %v1014_v60 = vadd.f32 %v1550_v59, %v2006_v14  ;;  %v1005_v61 = vpop.f32.mrb[19].mxu1 }
 0x1f9   : > { %1197 = vst [vmem:[%s2010_s23 + $0xa0] sm:$0xff] %v1003_v58  ;;  %v1006_v62 = vadd.f32 %v2006_v14, %v1005_v61 }
 0x1fa   : > { %1200 = vst [vmem:[%s2010_s23 + $0xb8] sm:$0xff] %v1014_v60 }
 0x1fb   : > { %1198 = vst [vmem:[%s2010_s23 + $0xa8] sm:$0xff] %v1006_v62 }
 0x1fd   : > { %v1553_v63 = vpop.f32.mrb[20].mxu1 }
 0x1fe   : > { %v1027_v0 = vadd.f32 %v1553_v63, %v2006_v14  ;;  %v1018_v1 = vpop.f32.mrb[21].mxu1 }
 0x1ff   : > { %v1019_v2 = vadd.f32 %v2006_v14, %v1018_v1  ;;  %v1554_v3 = vpop.f32.mrb[22].mxu1 }
 0x200   : > { %1203 = vst [vmem:[%s2010_s23 + $0xd0] sm:$0xff] %v1027_v0  ;;  %v1030_v4 = vadd.f32 %v1554_v3, %v2006_v14  ;;  %v1021_v5 = vpop.f32.mrb[23].mxu1 }
 0x201   : > { %1201 = vst [vmem:[%s2010_s23 + $0xc0] sm:$0xff] %v1019_v2  ;;  %v1022_v6 = vadd.f32 %v2006_v14, %v1021_v5 }
 0x202   : > { %1204 = vst [vmem:[%s2010_s23 + $0xd8] sm:$0xff] %v1030_v4 }
 0x203   : > { %1202 = vst [vmem:[%s2010_s23 + $0xc8] sm:$0xff] %v1022_v6 }
 0x205   : > { %v1557_v7 = vpop.f32.mrb[24].mxu1 }
 0x206   : > { %v1043_v8 = vadd.f32 %v1557_v7, %v2006_v14  ;;  %v1034_v9 = vpop.f32.mrb[25].mxu1 }
 0x207   : > { %v1035_v10 = vadd.f32 %v2006_v14, %v1034_v9  ;;  %v1558_v11 = vpop.f32.mrb[26].mxu1 }
 0x208   : > { %1207 = vst [vmem:[%s2010_s23 + $0xf0] sm:$0xff] %v1043_v8  ;;  %v1046_v12 = vadd.f32 %v1558_v11, %v2006_v14  ;;  %v1037_v13 = vpop.f32.mrb[27].mxu1 }
 0x209   : > { %1205 = vst [vmem:[%s2010_s23 + $0xe0] sm:$0xff] %v1035_v10  ;;  %v1038_v15 = vadd.f32 %v2006_v14, %v1037_v13 }
 0x20a   : > { %1208 = vst [vmem:[%s2010_s23 + $0xf8] sm:$0xff] %v1046_v12 }
 0x20b   : > { %1206 = vst [vmem:[%s2010_s23 + $0xe8] sm:$0xff] %v1038_v15 }
 0x20d   : > { %v1561_v16 = vpop.f32.mrb[28].mxu1 }
 0x20e   : > { %v1059_v42 = vadd.f32 %v1561_v16, %v2006_v14  ;;  %v1050_v17 = vpop.f32.mrb[29].mxu1 }
 0x20f   : > { %v1051_v18 = vadd.f32 %v2006_v14, %v1050_v17  ;;  %v1562_v19 = vpop.f32.mrb[30].mxu1 }
 0x210   : > { %1211 = vst [vmem:[%s2010_s23 + $0x110] sm:$0xff] %v1059_v42  ;;  %v1062_v20 = vadd.f32 %v1562_v19, %v2006_v14  ;;  %v1053_v21 = vpop.f32.mrb[31].mxu1 }
 0x211   : > { %1209 = vst [vmem:[%s2010_s23 + $0x100] sm:$0xff] %v1051_v18  ;;  %v1054_v22 = vadd.f32 %v2006_v14, %v1053_v21 }
 0x212   : > { %1212 = vst [vmem:[%s2010_s23 + $0x118] sm:$0xff] %v1062_v20 }
 0x213   : > { %1210 = vst [vmem:[%s2010_s23 + $0x108] sm:$0xff] %v1054_v22 }
 0x215   : > { %v1565_v23 = vpop.f32.mrb[32].mxu1 }
 0x216   : > { %v1075_v24 = vadd.f32 %v1565_v23, %v2006_v14  ;;  %v1066_v25 = vpop.f32.mrb[33].mxu1 }
 0x217   : > { %v1067_v26 = vadd.f32 %v2006_v14, %v1066_v25  ;;  %v1566_v27 = vpop.f32.mrb[34].mxu1 }
 0x218   : > { %1215 = vst [vmem:[%s2010_s23 + $0x130] sm:$0xff] %v1075_v24  ;;  %v1078_v28 = vadd.f32 %v1566_v27, %v2006_v14  ;;  %v1069_v29 = vpop.f32.mrb[35].mxu1 }
 0x219   : > { %1213 = vst [vmem:[%s2010_s23 + $0x120] sm:$0xff] %v1067_v26  ;;  %v1070_v30 = vadd.f32 %v2006_v14, %v1069_v29 }
 0x21a   : > { %1216 = vst [vmem:[%s2010_s23 + $0x138] sm:$0xff] %v1078_v28 }
 0x21b   : > { %1214 = vst [vmem:[%s2010_s23 + $0x128] sm:$0xff] %v1070_v30 }
 0x21d   : > { %v1569_v31 = vpop.f32.mrb[36].mxu1 }
 0x21e   : > { %v1091_v32 = vadd.f32 %v1569_v31, %v2006_v14  ;;  %v1082_v33 = vpop.f32.mrb[37].mxu1 }
 0x21f   : > { %v1083_v34 = vadd.f32 %v2006_v14, %v1082_v33  ;;  %v1570_v35 = vpop.f32.mrb[38].mxu1 }
 0x220   : > { %1219 = vst [vmem:[%s2010_s23 + $0x150] sm:$0xff] %v1091_v32  ;;  %v1094_v36 = vadd.f32 %v1570_v35, %v2006_v14  ;;  %v1085_v37 = vpop.f32.mrb[39].mxu1 }
 0x221   : > { %1217 = vst [vmem:[%s2010_s23 + $0x140] sm:$0xff] %v1083_v34  ;;  %v1086_v38 = vadd.f32 %v2006_v14, %v1085_v37 }
 0x222   : > { %1220 = vst [vmem:[%s2010_s23 + $0x158] sm:$0xff] %v1094_v36 }
 0x223   : > { %1218 = vst [vmem:[%s2010_s23 + $0x148] sm:$0xff] %v1086_v38 }
 0x225   : > { %v1573_v39 = vpop.f32.mrb[40].mxu1 }
 0x226   : > { %v1107_v40 = vadd.f32 %v1573_v39, %v2006_v14  ;;  %v1098_v41 = vpop.f32.mrb[41].mxu1 }
 0x227   : > { %v1099_v43 = vadd.f32 %v2006_v14, %v1098_v41  ;;  %v1574_v44 = vpop.f32.mrb[42].mxu1 }
 0x228   : > { %1223 = vst [vmem:[%s2010_s23 + $0x170] sm:$0xff] %v1107_v40  ;;  %v1110_v45 = vadd.f32 %v1574_v44, %v2006_v14  ;;  %v1101_v46 = vpop.f32.mrb[43].mxu1 }
 0x229   : > { %1221 = vst [vmem:[%s2010_s23 + $0x160] sm:$0xff] %v1099_v43  ;;  %v1102_v47 = vadd.f32 %v2006_v14, %v1101_v46 }
 0x22a   : > { %1224 = vst [vmem:[%s2010_s23 + $0x178] sm:$0xff] %v1110_v45 }
 0x22b   : > { %1222 = vst [vmem:[%s2010_s23 + $0x168] sm:$0xff] %v1102_v47 }
 0x22d   : > { %v1577_v48 = vpop.f32.mrb[44].mxu1 }
 0x22e   : > { %v1123_v49 = vadd.f32 %v1577_v48, %v2006_v14  ;;  %v1114_v50 = vpop.f32.mrb[45].mxu1 }
 0x22f   : > { %v1115_v51 = vadd.f32 %v2006_v14, %v1114_v50  ;;  %v1578_v52 = vpop.f32.mrb[46].mxu1 }
 0x230   : > { %1227 = vst [vmem:[%s2010_s23 + $0x190] sm:$0xff] %v1123_v49  ;;  %v1126_v53 = vadd.f32 %v1578_v52, %v2006_v14  ;;  %v1117_v54 = vpop.f32.mrb[47].mxu1 }
 0x231   : > { %1225 = vst [vmem:[%s2010_s23 + $0x180] sm:$0xff] %v1115_v51  ;;  %v1118_v55 = vadd.f32 %v2006_v14, %v1117_v54 }
 0x232   : > { %1228 = vst [vmem:[%s2010_s23 + $0x198] sm:$0xff] %v1126_v53 }
 0x233   : > { %1226 = vst [vmem:[%s2010_s23 + $0x188] sm:$0xff] %v1118_v55 }
 0x235   : > { %v1581_v56 = vpop.f32.mrb[48].mxu1 }
 0x236   : > { %v1139_v57 = vadd.f32 %v1581_v56, %v2006_v14  ;;  %v1130_v58 = vpop.f32.mrb[49].mxu1 }
 0x237   : > { %v1131_v59 = vadd.f32 %v2006_v14, %v1130_v58  ;;  %v1582_v60 = vpop.f32.mrb[50].mxu1 }
 0x238   : > { %1231 = vst [vmem:[%s2010_s23 + $0x1b0] sm:$0xff] %v1139_v57  ;;  %v1142_v61 = vadd.f32 %v1582_v60, %v2006_v14  ;;  %v1133_v62 = vpop.f32.mrb[51].mxu1 }
 0x239   : > { %1229 = vst [vmem:[%s2010_s23 + $0x1a0] sm:$0xff] %v1131_v59  ;;  %v1134_v63 = vadd.f32 %v2006_v14, %v1133_v62 }
 0x23a   : > { %1232 = vst [vmem:[%s2010_s23 + $0x1b8] sm:$0xff] %v1142_v61 }
 0x23b   : > { %1230 = vst [vmem:[%s2010_s23 + $0x1a8] sm:$0xff] %v1134_v63 }
 0x23d   : > { %v1585_v0 = vpop.f32.mrb[52].mxu1 }
 0x23e   : > { %v1155_v1 = vadd.f32 %v1585_v0, %v2006_v14  ;;  %v1146_v2 = vpop.f32.mrb[53].mxu1 }
 0x23f   : > { %v1147_v3 = vadd.f32 %v2006_v14, %v1146_v2  ;;  %v1586_v4 = vpop.f32.mrb[54].mxu1 }
 0x240   : > { %1235 = vst [vmem:[%s2010_s23 + $0x1d0] sm:$0xff] %v1155_v1  ;;  %v1158_v5 = vadd.f32 %v1586_v4, %v2006_v14  ;;  %v1149_v6 = vpop.f32.mrb[55].mxu1 }
 0x241   : > { %1233 = vst [vmem:[%s2010_s23 + $0x1c0] sm:$0xff] %v1147_v3  ;;  %v1150_v7 = vadd.f32 %v2006_v14, %v1149_v6 }
 0x242   : > { %1236 = vst [vmem:[%s2010_s23 + $0x1d8] sm:$0xff] %v1158_v5 }
 0x243   : > { %1234 = vst [vmem:[%s2010_s23 + $0x1c8] sm:$0xff] %v1150_v7 }
 0x245   : > { %v1589_v8 = vpop.f32.mrb[56].mxu1 }
 0x246   : > { %v1171_v9 = vadd.f32 %v1589_v8, %v2006_v14  ;;  %v1162_v10 = vpop.f32.mrb[57].mxu1 }
 0x247   : > { %v1163_v11 = vadd.f32 %v2006_v14, %v1162_v10  ;;  %v1590_v12 = vpop.f32.mrb[58].mxu1 }
 0x248   : > { %1239 = vst [vmem:[%s2010_s23 + $0x1f0] sm:$0xff] %v1171_v9  ;;  %v1174_v13 = vadd.f32 %v1590_v12, %v2006_v14  ;;  %v1165_v15 = vpop.f32.mrb[59].mxu1 }
 0x249   : > { %1237 = vst [vmem:[%s2010_s23 + $0x1e0] sm:$0xff] %v1163_v11  ;;  %v1166_v16 = vadd.f32 %v2006_v14, %v1165_v15 }
 0x24a   : > { %1240 = vst [vmem:[%s2010_s23 + $0x1f8] sm:$0xff] %v1174_v13 }
 0x24b   : > { %1238 = vst [vmem:[%s2010_s23 + $0x1e8] sm:$0xff] %v1166_v16 }
 0x24c   : > { %1670 = shalt.err (!%p1667_p3)
}
 0x24d   : > { %s1671_s12 = scalar_lea.hbm %s2139_s7, 8192  ;;  %s1675_s15 = scalar_lea.hbm %s2195_s5, 16384 }
 0x24e   : > { %p1672_p4 = scmp.ne.s32.totalorder %s2139_s7, %s1671_s12  ;;  %p1676_p9 = scmp.lt.u32.totalorder %s2139_s7, %s2195_s5 }
 0x24f   : > { %p1677_p10 = scmp.lt.u32.totalorder %s1675_s15, %s1671_s12  ;;  %p1679_p12 = scmp.lt.u32.totalorder %s1671_s12, %s2139_s7 }
 0x250   : > { %p1673_p7 = pnand %p1672_p4, %p1792_p5 }
 0x251   : > { %p1678_p11 = por %p1677_p10, %p1676_p9 }
 0x252   : > { %p1674_p8 = pneg %p1673_p7 }
 0x253   : > { %p1680_p13 = por %p1679_p12, %p1678_p11 }
 0x255   : > { %p1681_p0 = pnand %p1680_p13, %p1674_p8 }
 0x257   : > { %1684 = shalt.err (!%p1681_p0)
}
 0x258   : > { %s1722_s23 = smov 128   ;;  %s1723_s25 = smov 8  }
 0x259   : > { %1608 = dma.vmem_to_hbm [thread:$0]  (%p1792_p5), %s2141_s26, 8192, %s2139_s7, %s2149_s22, %s1722_s23, %s1722_s23, %s1723_s25  }
 0x25a PF: > { %p1614_p1 = scmp.ge.s32.totalorder %s1719_s21, 2  ;;  %s1270_s30 = sand.u32 1, %s1707_s18  }
 0x25b   : > { %s1271_s6 = scalar_lea.sflag [#allocation3], %s1270_s30 }
 0x25c   : > { %p1611_p2 = pnand %p1614_p1, %p1796_p6 }
 0x25e   : > { %1702 = dma.done.wait (!%p1611_p2), %s1271_s6, 8192  }
 0x25f   : > { %1704 = vsyncadd (!%p1611_p2), %s1271_s6, 4294959104  ;;  %p15_p3 = scmp.ge.s32.totalorder %s1779_s24, 4   ;;  %s2198_s18 = smov %s1711_s19 }
 0x260   : > { %s2199_s19 = smov %s1715_s20  ;;  %s2200_s20 = smov %s1790_s27 }
 0x261   : > { %s2201_s21 = smov %s1779_s24  ;;  %17 = sbr.rel (!%p15_p3) target bundleno = 3 (0x3), region = 75 }
 0x268   :  { %1276 = vsyncpa [#allocation3], 1 }
 0x269   :  { %1278 = vsyncpa [#allocation3 + $0x1], 1 }

</bundles_post_ra>
